<compile_context>
chip_gen: v7x
topology: tpu7x:2x2x1
jax: 0.10.0
libtpu: 0.0.40
codegen_flags: <defaults>
</compile_context>

<pallas_src>
import functools

import jax
import jax.numpy as jnp
from jax.experimental import pallas as pl
from jax.experimental.pallas import tpu as pltpu


def _round_up(x: int, m: int) -> int:
    return ((x + m - 1) // m) * m


def _vmem_budget_bytes() -> int:
    """~75% of per-core VMEM (headroom for compiler scratch / semaphores)."""
    try:
        cap = int(pltpu.get_tpu_info().vmem_capacity_bytes)
    except Exception:
        cap = 64 << 20  # conservative default: v7x per-core VMEM
    return (cap * 3) // 4


def _linear_relu_kernel(x_ref, w_ref, b_ref, o_ref):
    # x_ref: (tm, K) f32/bf16, w_ref: (K, tn) bf16 (or f32), b_ref: (1, tn) f32.
    # Cast the activation tile in-kernel (VPU) so no bf16 copy of x is ever
    # materialized in HBM; matmul runs on the MXU with f32 accumulation.
    x = x_ref[...].astype(w_ref.dtype)
    y = jnp.dot(x, w_ref[...], preferred_element_type=jnp.float32)
    o_ref[...] = jnp.maximum(y + b_ref[...], 0.0).astype(o_ref.dtype)


def _tile_m_candidates(M, tm_target):
    tm0 = min(tm_target, _round_up(M, 8))
    return [tm0] + [t for t in (1024, 512, 256, 128, 64, 32, 16, 8) if t < tm0]


def _fits(tm, tn, K, x_bytes, w_bytes, o_bytes, budget):
    # Pallas double-buffers every BlockSpec (input and output).
    per_buf = tm * K * x_bytes + K * tn * w_bytes + tn * 4 + tm * tn * o_bytes
    return 2 * per_buf <= budget


def _choose_tiles(M, K, N_pad, x_bytes, w_bytes, o_bytes, budget, tm_target):
    # 1) Weight-resident layout: single N tile, 1-D row grid.
    for tm in _tile_m_candidates(M, tm_target):
        if _fits(tm, N_pad, K, x_bytes, w_bytes, o_bytes, budget):
            return tm, N_pad
    # 2) Tile N as well (one operand gets re-streamed by a grid axis).
    for tn in (512, 256, 128):
        if tn >= N_pad or N_pad % tn != 0:
            continue
        for tm in _tile_m_candidates(M, tm_target):
            if _fits(tm, tn, K, x_bytes, w_bytes, o_bytes, budget):
                return tm, tn
    return None  # give up -> XLA fallback


@functools.partial(jax.jit, static_argnames=("n_out", "out_dtype"))
def linear_relu(x2d, w, b, *, n_out, out_dtype=jnp.float32):
    """ReLU(x2d @ w + b)[:, :n_out].

    x2d: [M, K] f32 (or bf16); w: [K, N_pad] bf16/f32 with N_pad % 128 == 0;
    b: [1, N_pad] f32.  Returns [M, n_out] in out_dtype (bf16 output is a
    useful byte saver on v5e if the consumer accepts it).
    """
    M, K = x2d.shape
    Kw, N_pad = w.shape
    assert K == Kw and b.shape == (1, N_pad)
    assert N_pad % 128 == 0 and n_out <= N_pad

    x_bytes = jnp.dtype(x2d.dtype).itemsize
    w_bytes = jnp.dtype(w.dtype).itemsize
    o_bytes = jnp.dtype(out_dtype).itemsize

    budget = _vmem_budget_bytes()
    tm_target = 1024 if budget >= (80 << 20) else 512  # v5e/v6e vs v7x
    tiles = _choose_tiles(M, K, N_pad, x_bytes, w_bytes, o_bytes, budget,
                          tm_target)

    # Tiny problems: per-step pipeline + launch overhead dominates; let XLA do it.
    small = 2 * M * K * N_pad < (1 << 22)
    if tiles is None or small:
        # TODO(synk): add a K-tiled (reduction grid axis + f32 VMEM accumulator)
        # Pallas path for in_channels too large to keep a full-K tile in VMEM.
        y = jnp.dot(x2d.astype(w.dtype), w,
                    preferred_element_type=jnp.float32) + b
        return jnp.maximum(y, 0.0)[:, :n_out].astype(out_dtype)

    tm, tn = tiles
    gm = pl.cdiv(M, tm)

    if tn == N_pad:
        # Weight-resident: constant w/b block index -> fetched from HBM once.
        grid = (gm,)
        in_specs = [
            pl.BlockSpec((tm, K), lambda i: (i, 0)),   # activation row tile
            pl.BlockSpec((K, tn), lambda i: (0, 0)),   # full weight (resident)
            pl.BlockSpec((1, tn), lambda i: (0, 0)),   # full bias (resident)
        ]
        out_spec = pl.BlockSpec((tm, tn), lambda i: (i, 0))
        dims = ("parallel",)
        bytes_accessed = (M * K * x_bytes + K * N_pad * w_bytes + N_pad * 4
                          + M * N_pad * o_bytes)
    else:
        gn = N_pad // tn
        # Pick the grid ordering that streams the larger operand exactly once.
        traffic_j_inner = M * K * x_bytes + gm * K * N_pad * w_bytes
        traffic_i_inner = gn * M * K * x_bytes + K * N_pad * w_bytes
        if traffic_j_inner <= traffic_i_inner:
            grid = (gm, gn)                                   # N innermost
            in_specs = [
                pl.BlockSpec((tm, K), lambda i, j: (i, 0)),
                pl.BlockSpec((K, tn), lambda i, j: (0, j)),
                pl.BlockSpec((1, tn), lambda i, j: (0, j)),
            ]
            out_spec = pl.BlockSpec((tm, tn), lambda i, j: (i, j))
            bytes_accessed = traffic_j_inner + N_pad * 4 + M * N_pad * o_bytes
        else:
            grid = (gn, gm)                                   # M innermost
            in_specs = [
                pl.BlockSpec((tm, K), lambda j, i: (i, 0)),
                pl.BlockSpec((K, tn), lambda j, i: (0, j)),
                pl.BlockSpec((1, tn), lambda j, i: (0, j)),
            ]
            out_spec = pl.BlockSpec((tm, tn), lambda j, i: (i, j))
            bytes_accessed = traffic_i_inner + N_pad * 4 + M * N_pad * o_bytes
        dims = ("parallel", "parallel")

    cost = pl.CostEstimate(
        flops=2 * M * K * N_pad,
        transcendentals=0,
        bytes_accessed=int(bytes_accessed),
    )

    out = pl.pallas_call(
        _linear_relu_kernel,
        out_shape=jax.ShapeDtypeStruct((M, N_pad), out_dtype),
        grid_spec=pltpu.PrefetchScalarGridSpec(
            num_scalar_prefetch=0,
            grid=grid,
            in_specs=in_specs,
            out_specs=out_spec,
        ),
        compiler_params=pltpu.CompilerParams(
            dimension_semantics=dims,
            vmem_limit_bytes=int(budget),
        ),
        cost_estimate=cost,
    )(x2d, w, b)

    if N_pad != n_out:
        out = out[:, :n_out]
    return out


class Encoder:
    """JAX/Pallas port of the PyTorch Encoder (att=False, src_posi=False)."""

    def __init__(self, d_model, in_channels=2048, att=False, src_posi=False,
                 key=None, compute_dtype=jnp.bfloat16, out_dtype=jnp.float32):
        # TODO(synk): att=True (EncoderLayer stack + LayerNorm) and src_posi=True
        # (PositionalEncoding + dropout) branches are disabled by the module
        # defaults and are not implemented here.
        assert not att and not src_posi
        self.d_model = d_model
        self.in_channels = in_channels
        self.out_dtype = out_dtype
        if d_model != in_channels:
            if key is None:
                key = jax.random.PRNGKey(0)
            kw, kb = jax.random.split(key)
            bound = 1.0 / float(in_channels) ** 0.5
            # nn.Linear-style uniform init; stored pre-transposed [K, N].
            self.weight = jax.random.uniform(
                kw, (in_channels, d_model), jnp.float32, -bound, bound)
            self.bias = jax.random.uniform(
                kb, (1, d_model), jnp.float32, -bound, bound)
            # Kernel-ready copies built ONCE: compute dtype (bf16 by default,
            # pass compute_dtype=jnp.float32 for bit-closer numerics) and the N
            # axis padded to the 128-lane boundary so every store is lane-dense.
            n_pad = _round_up(d_model, 128)
            w_k = self.weight.astype(compute_dtype)
            b_k = self.bias.astype(jnp.float32)
            if n_pad != d_model:
                w_k = jnp.pad(w_k, ((0, 0), (0, n_pad - d_model)))
                b_k = jnp.pad(b_k, ((0, 0), (0, n_pad - d_model)))
            self.w_kernel = w_k
            self.b_kernel = b_k
        else:
            self.weight = self.bias = self.w_kernel = self.b_kernel = None

    def __call__(self, x):
        # Mirrors: `if self.d_model != x.size(-1): x = ReLU(Linear(x))`
        if self.d_model != x.shape[-1]:
            lead = x.shape[:-1]
            x2d = x.reshape((-1, x.shape[-1]))
            y2d = linear_relu(x2d, self.w_kernel, self.b_kernel,
                              n_out=self.d_model, out_dtype=self.out_dtype)
            return y2d.reshape(lead + (self.d_model,))
        return x


if __name__ == "__main__":
    key = jax.random.PRNGKey(0)
    k_x, k_p, k_x2, k_p2 = jax.random.split(key, 4)

    # --- Pallas path: module-default in_channels, small batch/seq -----------
    B, S, C, D = 2, 8, 2048, 256
    x = jax.random.normal(k_x, (B, S, C), dtype=jnp.float32)
    enc = Encoder(d_model=D, in_channels=C, key=k_p)
    out = jax.block_until_ready(enc(x))
    assert out.shape == (B, S, D)

    # Pure-JAX reference with the same bf16 operand rounding, f32 accumulation.
    xb = x.reshape(-1, C).astype(jnp.bfloat16).astype(jnp.float32)
    wb = enc.weight.astype(jnp.bfloat16).astype(jnp.float32)
    ref = jnp.maximum(
        jnp.dot(xb, wb, precision=jax.lax.Precision.HIGHEST) + enc.bias, 0.0
    ).reshape(B, S, D)
    assert jnp.allclose(out, ref, atol=1e-2, rtol=1e-2), float(
        jnp.max(jnp.abs(out - ref)))

    # --- Tiny-problem path (XLA fallback, correctness only) -----------------
    x_small = jax.random.normal(k_x2, (2, 8, 32), dtype=jnp.float32)
    enc_small = Encoder(d_model=16, in_channels=32, key=k_p2)
    out_small = jax.block_until_ready(enc_small(x_small))
    ref_small = jnp.maximum(
        x_small.reshape(-1, 32).astype(jnp.bfloat16).astype(jnp.float32)
        @ enc_small.weight.astype(jnp.bfloat16).astype(jnp.float32)
        + enc_small.bias, 0.0).reshape(2, 8, 16)
    assert out_small.shape == (2, 8, 16)
    assert jnp.allclose(out_small, ref_small, atol=1e-2, rtol=1e-2)

    # --- Identity path (d_model == in_channels) ------------------------------
    enc_id = Encoder(d_model=32, in_channels=32)
    out_id = jax.block_until_ready(enc_id(x_small))
    assert jnp.array_equal(out_id, x_small)

    print("KERNEL_OK")
</pallas_src>

<mosaic_0001>
module attributes {stable_mosaic.version = 11 : i64} {
  func.func @_linear_relu_kernel(%arg0: i32, %arg1: memref<16x2048xf32, #tpu.memory_space<vmem>>, %arg2: memref<2048x256xbf16, #tpu.memory_space<vmem>>, %arg3: memref<1x256xf32, #tpu.memory_space<vmem>>, %arg4: memref<16x256xf32, #tpu.memory_space<vmem>>) attributes {dimension_semantics = [#tpu.dimension_semantics<parallel>], iteration_bounds = array<i64: 1>, scalar_prefetch = 0 : i64, scratch_operands = 0 : i64, tpu.core_type = #tpu.core_type<tc>, window_params = [{transform_indices = @transform_0, window_bounds = array<i64: 16, 2048>}, {pipeline_mode = #tpu.pipeline_mode<synchronous>, transform_indices = @transform_1, window_bounds = array<i64: 2048, 256>}, {pipeline_mode = #tpu.pipeline_mode<synchronous>, transform_indices = @transform_2, window_bounds = array<i64: 1, 256>}, {transform_indices = @transform_3, window_bounds = array<i64: 16, 256>}]} {
    %c0 = arith.constant 0 : index
    %c0_0 = arith.constant 0 : index
    %0 = vector.load %arg1[%c0, %c0_0] : memref<16x2048xf32, #tpu.memory_space<vmem>>, vector<16x2048xf32>
    %1 = arith.truncf %0 : vector<16x2048xf32> to vector<16x2048xbf16>
    %c0_1 = arith.constant 0 : index
    %c0_2 = arith.constant 0 : index
    %2 = vector.load %arg2[%c0_1, %c0_2] : memref<2048x256xbf16, #tpu.memory_space<vmem>>, vector<2048x256xbf16>
    %cst = arith.constant dense<0.000000e+00> : vector<16x256xf32>
    %3 = tpu.matmul %1, %2, %cst {dimension_numbers = #tpu.dot_dimension_numbers<[1], [0], [0], [1], [0, 0, 1, 1], [], []>} : vector<16x2048xbf16>, vector<2048x256xbf16>, vector<16x256xf32> -> vector<16x256xf32>
    %c0_3 = arith.constant 0 : index
    %c0_4 = arith.constant 0 : index
    %4 = vector.load %arg3[%c0_3, %c0_4] : memref<1x256xf32, #tpu.memory_space<vmem>>, vector<1x256xf32>
    %5 = vector.broadcast %4 : vector<1x256xf32> to vector<16x256xf32>
    %6 = arith.addf %3, %5 : vector<16x256xf32>
    %cst_5 = arith.constant 0.000000e+00 : f32
    %7 = vector.broadcast %cst_5 : f32 to vector<16x256xf32>
    %8 = arith.maximumf %6, %7 : vector<16x256xf32>
    %c0_6 = arith.constant 0 : index
    %c0_7 = arith.constant 0 : index
    %9 = vector.load %arg4[%c0_6, %c0_7] : memref<16x256xf32, #tpu.memory_space<vmem>>, vector<16x256xf32>
    tpu.vector_store %arg4[%c0_6, %c0_7], %8 {strides = array<i32>} : memref<16x256xf32, #tpu.memory_space<vmem>>, vector<16x256xf32>,
    return
  }
  func.func @transform_0(%arg0: i32) -> (i32, i32) {
    %c0_i32 = arith.constant 0 : i32
    %c0_i32_0 = arith.constant 0 : i32
    return %arg0, %c0_i32 : i32, i32
  }
  func.func @transform_1(%arg0: i32) -> (i32, i32) {
    %c0_i32 = arith.constant 0 : i32
    %c0_i32_0 = arith.constant 0 : i32
    %c0_i32_1 = arith.constant 0 : i32
    return %c0_i32, %c0_i32_0 : i32, i32
  }
  func.func @transform_2(%arg0: i32) -> (i32, i32) {
    %c0_i32 = arith.constant 0 : i32
    %c0_i32_0 = arith.constant 0 : i32
    %c0_i32_1 = arith.constant 0 : i32
    return %c0_i32, %c0_i32_0 : i32, i32
  }
  func.func @transform_3(%arg0: i32) -> (i32, i32) {
    %c0_i32 = arith.constant 0 : i32
    %c0_i32_0 = arith.constant 0 : i32
    return %arg0, %c0_i32 : i32, i32
  }
}

</mosaic_0001>

<bundles_post_ra>
// kernel: linear_relu.1
= control target key start
LH: loop header
LB: loop body
LE: loop exit
PB: predicated region body
PF: predicated region fallthrough
CT: control target
= control target key end

     0   :  { %8 = vsyncpa [#allocation3], 0  ;;  %s2828_s0 = inlined_call_operand.hbm [shape: f32[16,2048], index: 0, kind: input, shape index: {}]   ;;  %s2829_s1 = inlined_call_operand.hbm [shape: bf16[2048,256], index: 1, kind: input, shape index: {}]   ;;  %s2830_s2 = inlined_call_operand.vmem [shape: f32[1,256], index: 2, kind: input, shape index: {}]   ;;  %s2831_s3 = inlined_call_operand.hbm [shape: f32[16,256], index: 3, kind: output, shape index: {}]  }
   0x1   :  { %9 = vsyncpa [#allocation6], 0 }
   0x2   :  { %10 = vsyncpa [#allocation4], 0  ;;  %s2761_s12 = smov [#allocation2]   ;;  %s2689_s16 = scalar_lea.hbm %s2828_s0, 4096 }
   0x3   :  { %s16_s13 = sshll.u32 %s2761_s12, 4  ;;  %p2690_p0 = scmp.ne.s32.totalorder %s2828_s0, %s2689_s16  ;;  %s17_s13 = int_to_ptr.vmem [resolvable:$true] %s16_s13 }
   0x4   :  { %p2693_p1 = scmp.lt.u32.totalorder %s2689_s16, %s2828_s0 }
   0x6   :  { %p2695_p2 = pnand %p2693_p1, %p2690_p0 }
   0x8   :  { %2698 = shalt.err (!%p2695_p2)
}
   0x9   :  { %s2699_s21 = scalar_lea.vmem %s17_s13, 4096  ;;  %p2704_p4 = scmp.lt.s32.totalorder %s17_s13, %s17_s13 }
   0xa   :  { %p2700_p3 = scmp.ne.s32.totalorder %s17_s13, %s2699_s21  ;;  %p2705_p5 = scmp.lt.s32.totalorder %s2699_s21, %s2699_s21 }
   0xc   :  { %p2706_p6 = por %p2705_p5, %p2704_p4 }
   0xe   :  { %p2707_p7 = pnand %p2706_p6, %p2700_p3 }
  0x10   :  { %2710 = shalt.err (!%p2707_p7)
}
  0x11   :  { %s2762_s22 = smov 2048   ;;  %s2763_s23 = smov 128  }
  0x12   :  { %22 = dma.hbm_to_vmem [thread:$0]  %s2828_s0, 4096, %s17_s13, [#allocation3], %s2762_s22, %s2762_s22, %s2763_s23  }
  0x13   :  { %s2764_s26 = smov [#allocation5]   ;;  %s2711_s30 = scalar_lea.hbm %s2829_s1, 32768 }
  0x14   :  { %s28_s27 = sshll.u32 %s2764_s26, 4  ;;  %p2712_p8 = scmp.ne.s32.totalorder %s2829_s1, %s2711_s30  ;;  %s29_s27 = int_to_ptr.vmem [resolvable:$true] %s28_s27 }
  0x15   :  { %p2715_p9 = scmp.lt.u32.totalorder %s2711_s30, %s2829_s1 }
  0x17   :  { %p2717_p10 = pnand %p2715_p9, %p2712_p8 }
  0x19   :  { %2720 = shalt.err (!%p2717_p10)
}
  0x1a   :  { %s2721_s8 = scalar_lea.vmem %s29_s27, 32768  ;;  %p2726_p12 = scmp.lt.s32.totalorder %s29_s27, %s29_s27 }
  0x1b   :  { %p2722_p11 = scmp.ne.s32.totalorder %s29_s27, %s2721_s8  ;;  %p2727_p13 = scmp.lt.s32.totalorder %s2721_s8, %s2721_s8 }
  0x1d   :  { %p2728_p0 = por %p2727_p13, %p2726_p12 }
  0x1f   :  { %p2729_p1 = pnand %p2728_p0, %p2722_p11 }
  0x21   :  { %2732 = shalt.err (!%p2729_p1)
}
  0x22   :  { %s2765_s0 = smov 8  }
  0x23   :  { %34 = dma.hbm_to_vmem [thread:$0]  %s2829_s1, 32768, %s29_s27, [#allocation6], %s2763_s23, %s2763_s23, %s2765_s0  }
  0x24   :  { %2755 = dma.done.wait [#allocation3], 4096  }
  0x25   :  { %2756 = vsyncadd [#allocation3], 4294963200 }
  0x26   :  { %2757 = dma.done.wait [#allocation6], 32768  }
  0x27   :  { %2758 = vsyncadd [#allocation6], 4294934528  ;;  %v2305_v0 = vld [vmem:[#allocation5 + $0x4] ss:$8 sps:$4 sm:$0xff]   ;;  %v2309_v2 = vld [vmem:[#allocation5] ss:$8 sps:$4 sm:$0xff]  }
  0x28   :  { %v2307_v1 = vld [vmem:[#allocation5 + $0x404] ss:$8 sps:$4 sm:$0xff]   ;;  %1639 = vmatprep.subr.bf16.mxu1 %v2305_v0  ;;  %v2310_v3 = vld [vmem:[#allocation5 + $0x400] ss:$8 sps:$4 sm:$0xff]   ;;  %v2311_v4 = vld [vmem:[#allocation5 + $0x14] ss:$8 sps:$4 sm:$0xff]  }
  0x29   :  { %1811 = vmatprep.subr.bf16.mxu0 %v2307_v1  ;;  %1640 = vmatpush1.bf16.msra.mxu1 %v2309_v2  ;;  %v2313_v5 = vld [vmem:[#allocation5 + $0x414] ss:$8 sps:$4 sm:$0xff]   ;;  %v2315_v6 = vld [vmem:[#allocation5 + $0x10] ss:$8 sps:$4 sm:$0xff]   ;;  %v2317_v8 = vld [vmem:[#allocation5 + $0x24] ss:$8 sps:$4 sm:$0xff]  }
  0x2a   :  { %1812 = vmatpush1.bf16.msra.mxu0 %v2310_v3  ;;  %1641 = vmatprep.subr.bf16.mxu1 %v2311_v4  ;;  %v2316_v7 = vld [vmem:[#allocation5 + $0x410] ss:$8 sps:$4 sm:$0xff]   ;;  %v2319_v9 = vld [vmem:[#allocation5 + $0x424] ss:$8 sps:$4 sm:$0xff]   ;;  %v2321_v10 = vld [vmem:[#allocation5 + $0x20] ss:$8 sps:$4 sm:$0xff]  }
  0x2b   :  { %1813 = vmatprep.subr.bf16.mxu0 %v2313_v5  ;;  %v2322_v11 = vld [vmem:[#allocation5 + $0x420] ss:$8 sps:$4 sm:$0xff]   ;;  %v2323_v12 = vld [vmem:[#allocation5 + $0x34] ss:$8 sps:$4 sm:$0xff]   ;;  %v2327_v14 = vld [vmem:[#allocation5 + $0x30] ss:$8 sps:$4 sm:$0xff]  }
  0x2c   :  { %v2325_v13 = vld [vmem:[#allocation5 + $0x434] ss:$8 sps:$4 sm:$0xff]   ;;  %v2328_v15 = vld [vmem:[#allocation5 + $0x430] ss:$8 sps:$4 sm:$0xff]   ;;  %v2329_v16 = vld [vmem:[#allocation5 + $0x44] ss:$8 sps:$4 sm:$0xff]  }
  0x2d   :  { %1642 = vmatpush1.bf16.msra.mxu1 %v2315_v6  ;;  %v2331_v17 = vld [vmem:[#allocation5 + $0x444] ss:$8 sps:$4 sm:$0xff]   ;;  %v2333_v18 = vld [vmem:[#allocation5 + $0x40] ss:$8 sps:$4 sm:$0xff]   ;;  %v2335_v20 = vld [vmem:[#allocation5 + $0x54] ss:$8 sps:$4 sm:$0xff]  }
  0x2e   :  { %1814 = vmatpush1.bf16.msra.mxu0 %v2316_v7  ;;  %1643 = vmatprep.subr.bf16.mxu1 %v2317_v8  ;;  %v2334_v19 = vld [vmem:[#allocation5 + $0x440] ss:$8 sps:$4 sm:$0xff]   ;;  %v2337_v21 = vld [vmem:[#allocation5 + $0x454] ss:$8 sps:$4 sm:$0xff]   ;;  %v2339_v22 = vld [vmem:[#allocation5 + $0x50] ss:$8 sps:$4 sm:$0xff]  }
  0x2f   :  { %1815 = vmatprep.subr.bf16.mxu0 %v2319_v9  ;;  %v2340_v23 = vld [vmem:[#allocation5 + $0x450] ss:$8 sps:$4 sm:$0xff]   ;;  %v2341_v24 = vld [vmem:[#allocation5 + $0x64] ss:$8 sps:$4 sm:$0xff]   ;;  %v2345_v26 = vld [vmem:[#allocation5 + $0x60] ss:$8 sps:$4 sm:$0xff]  }
  0x30   :  { %v2343_v25 = vld [vmem:[#allocation5 + $0x464] ss:$8 sps:$4 sm:$0xff]   ;;  %v2346_v27 = vld [vmem:[#allocation5 + $0x460] ss:$8 sps:$4 sm:$0xff]   ;;  %v2347_v28 = vld [vmem:[#allocation5 + $0x74] ss:$8 sps:$4 sm:$0xff]  }
  0x31   :  { %1644 = vmatpush1.bf16.msra.mxu1 %v2321_v10  ;;  %v2349_v29 = vld [vmem:[#allocation5 + $0x474] ss:$8 sps:$4 sm:$0xff]   ;;  %v2351_v30 = vld [vmem:[#allocation5 + $0x70] ss:$8 sps:$4 sm:$0xff]   ;;  %v2353_v32 = vld [vmem:[#allocation5 + $0x84] ss:$8 sps:$4 sm:$0xff]  }
  0x32   :  { %1816 = vmatpush1.bf16.msra.mxu0 %v2322_v11  ;;  %1645 = vmatprep.subr.bf16.mxu1 %v2323_v12  ;;  %v2352_v31 = vld [vmem:[#allocation5 + $0x470] ss:$8 sps:$4 sm:$0xff]   ;;  %v2355_v33 = vld [vmem:[#allocation5 + $0x484] ss:$8 sps:$4 sm:$0xff]   ;;  %v2357_v34 = vld [vmem:[#allocation5 + $0x80] ss:$8 sps:$4 sm:$0xff]  }
  0x33   :  { %1817 = vmatprep.subr.bf16.mxu0 %v2325_v13  ;;  %v2358_v35 = vld [vmem:[#allocation5 + $0x480] ss:$8 sps:$4 sm:$0xff]   ;;  %v2359_v36 = vld [vmem:[#allocation5 + $0x94] ss:$8 sps:$4 sm:$0xff]   ;;  %v2363_v38 = vld [vmem:[#allocation5 + $0x90] ss:$8 sps:$4 sm:$0xff]  }
  0x34   :  { %v2361_v37 = vld [vmem:[#allocation5 + $0x494] ss:$8 sps:$4 sm:$0xff]   ;;  %v2364_v39 = vld [vmem:[#allocation5 + $0x490] ss:$8 sps:$4 sm:$0xff]   ;;  %v2365_v40 = vld [vmem:[#allocation5 + $0xa4] ss:$8 sps:$4 sm:$0xff]  }
  0x35   :  { %1646 = vmatpush1.bf16.msra.mxu1 %v2327_v14  ;;  %v2367_v41 = vld [vmem:[#allocation5 + $0x4a4] ss:$8 sps:$4 sm:$0xff]   ;;  %v2369_v42 = vld [vmem:[#allocation5 + $0xa0] ss:$8 sps:$4 sm:$0xff]   ;;  %v2371_v44 = vld [vmem:[#allocation5 + $0xb4] ss:$8 sps:$4 sm:$0xff]  }
  0x36   :  { %1818 = vmatpush1.bf16.msra.mxu0 %v2328_v15  ;;  %1647 = vmatprep.subr.bf16.mxu1 %v2329_v16  ;;  %v2370_v43 = vld [vmem:[#allocation5 + $0x4a0] ss:$8 sps:$4 sm:$0xff]   ;;  %v2373_v45 = vld [vmem:[#allocation5 + $0x4b4] ss:$8 sps:$4 sm:$0xff]   ;;  %v2375_v46 = vld [vmem:[#allocation5 + $0xb0] ss:$8 sps:$4 sm:$0xff]  }
  0x37   :  { %1819 = vmatprep.subr.bf16.mxu0 %v2331_v17  ;;  %v2376_v47 = vld [vmem:[#allocation5 + $0x4b0] ss:$8 sps:$4 sm:$0xff]   ;;  %v44_v48 = vld [vmem:[#allocation2 + $0x8] sm:$0xff]  ;;  %v2383_v58 = vld [vmem:[#allocation5 + $0xd4] ss:$8 sps:$4 sm:$0xff]   ;;  %s2766_s12 = smov [#allocation7]  }
  0x38   :  { %v60_v49 = vld [vmem:[#allocation2 + $0x88] sm:$0xff]  ;;  %v2385_v59 = vld [vmem:[#allocation5 + $0x4d4] ss:$8 sps:$4 sm:$0xff]   ;;  %v2387_v60 = vld [vmem:[#allocation5 + $0xd0] ss:$8 sps:$4 sm:$0xff]   ;;  %s1996_s13 = sshll.u32 %s2766_s12, 4  ;;  %s1997_s13 = int_to_ptr.vmem [resolvable:$true] %s1996_s13 }
  0x39   :  { %1648 = vmatpush1.bf16.msra.mxu1 %v2333_v18  ;;  %v2377_v50 = vld [vmem:[#allocation5 + $0xc4] ss:$8 sps:$4 sm:$0xff]   ;;  %v76_v52 = vpack.c.bf16 %v60_v49, %v44_v48  ;;  %v2381_v56 = vld [vmem:[#allocation5 + $0xc0] ss:$8 sps:$4 sm:$0xff]   ;;  %v2388_v61 = vld [vmem:[#allocation5 + $0x4d0] ss:$8 sps:$4 sm:$0xff]   ;;  %p2738_p3 = scmp.lt.s32.totalorder %s1997_s13, %s1997_s13 }
  0x3a   :  { %1820 = vmatpush1.bf16.msra.mxu0 %v2334_v19  ;;  %1649 = vmatprep.subr.bf16.mxu1 %v2335_v20  ;;  %v2379_v51 = vld [vmem:[#allocation5 + $0x4c4] ss:$8 sps:$4 sm:$0xff]   ;;  %v2382_v57 = vld [vmem:[#allocation5 + $0x4c0] ss:$8 sps:$4 sm:$0xff]   ;;  %v2395_v2 = vld [vmem:[#allocation5 + $0xf4] ss:$8 sps:$4 sm:$0xff]  }
  0x3b   :  { %1821 = vmatprep.subr.bf16.mxu0 %v2337_v21  ;;  %v52_v53 = vld [vmem:[#allocation2 + $0x48] sm:$0xff]  ;;  %1671 = vmatprep.mubr.bf16.mxu1 %v76_v52  ;;  %v2397_v3 = vld [vmem:[#allocation5 + $0x4f4] ss:$8 sps:$4 sm:$0xff]   ;;  %v2399_v4 = vld [vmem:[#allocation5 + $0xf0] ss:$8 sps:$4 sm:$0xff]  }
  0x3c   :  { %v68_v54 = vld [vmem:[#allocation2 + $0xc8] sm:$0xff]  ;;  %v2400_v5 = vld [vmem:[#allocation5 + $0x4f0] ss:$8 sps:$4 sm:$0xff]   ;;  %v43_v6 = vld [vmem:[#allocation2] sm:$0xff] }
  0x3d   :  { %1650 = vmatpush1.bf16.msra.mxu1 %v2339_v22  ;;  %v84_v55 = vpack.c.bf16 %v68_v54, %v52_v53  ;;  %v2389_v62 = vld [vmem:[#allocation5 + $0xe4] ss:$8 sps:$4 sm:$0xff]   ;;  %v2393_v0 = vld [vmem:[#allocation5 + $0xe0] ss:$8 sps:$4 sm:$0xff]   ;;  %v2409_v16 = vld [vmem:[#allocation5 + $0x114] ss:$8 sps:$4 sm:$0xff]  }
  0x3e   :  { %1822 = vmatpush1.bf16.msra.mxu0 %v2340_v23  ;;  %1651 = vmatprep.subr.bf16.mxu1 %v2341_v24  ;;  %v2391_v63 = vld [vmem:[#allocation5 + $0x4e4] ss:$8 sps:$4 sm:$0xff]   ;;  %v2394_v1 = vld [vmem:[#allocation5 + $0x4e0] ss:$8 sps:$4 sm:$0xff]   ;;  %v2412_v17 = vld [vmem:[#allocation5 + $0x514] ss:$8 sps:$4 sm:$0xff]  }
  0x3f   :  { %1823 = vmatprep.subr.bf16.mxu0 %v2343_v25  ;;  %1843 = vmatprep.mubr.bf16.mxu0 %v84_v55  ;;  %v2403_v7 = vld [vmem:[#allocation5 + $0x104] ss:$8 sps:$4 sm:$0xff]   ;;  %v2401_v12 = vld [vmem:[#allocation5 + $0x100] ss:$8 sps:$4 sm:$0xff]   ;;  %v2407_v18 = vld [vmem:[#allocation5 + $0x110] ss:$8 sps:$4 sm:$0xff]  }
  0x40   :  { %v59_v8 = vld [vmem:[#allocation2 + $0x80] sm:$0xff]  ;;  %v2410_v19 = vld [vmem:[#allocation5 + $0x510] ss:$8 sps:$4 sm:$0xff]   ;;  %v2421_v24 = vld [vmem:[#allocation5 + $0x134] ss:$8 sps:$4 sm:$0xff]  }
  0x41   :  { %1652 = vmatpush1.bf16.msra.mxu1 %v2345_v26  ;;  %v51_v9 = vld [vmem:[#allocation2 + $0x40] sm:$0xff]  ;;  %v75_v14 = vpack.c.bf16 %v59_v8, %v43_v6  ;;  %v2424_v25 = vld [vmem:[#allocation5 + $0x534] ss:$8 sps:$4 sm:$0xff]   ;;  %v2419_v26 = vld [vmem:[#allocation5 + $0x130] ss:$8 sps:$4 sm:$0xff]  }
  0x42   :  { %1824 = vmatpush1.bf16.msra.mxu0 %v2346_v27  ;;  %1653 = vmatprep.subr.bf16.mxu1 %v2347_v28  ;;  %v67_v10 = vld [vmem:[#allocation2 + $0xc0] sm:$0xff]  ;;  %v2422_v27 = vld [vmem:[#allocation5 + $0x530] ss:$8 sps:$4 sm:$0xff]   ;;  %v2457_v54 = vld [vmem:[#allocation5 + $0x194] ss:$8 sps:$4 sm:$0xff]  }
  0x43   :  { %1825 = vmatprep.subr.bf16.mxu0 %v2349_v29  ;;  %v2406_v11 = vld [vmem:[#allocation5 + $0x504] ss:$8 sps:$4 sm:$0xff]   ;;  %v2404_v13 = vld [vmem:[#allocation5 + $0x500] ss:$8 sps:$4 sm:$0xff]   ;;  %v83_v15 = vpack.c.bf16 %v67_v10, %v51_v9  ;;  %v2443_v48 = vld [vmem:[#allocation5 + $0x170] ss:$8 sps:$4 sm:$0xff]  }
  0x44   :  { %v2415_v20 = vld [vmem:[#allocation5 + $0x124] ss:$8 sps:$4 sm:$0xff]   ;;  %v2413_v22 = vld [vmem:[#allocation5 + $0x120] ss:$8 sps:$4 sm:$0xff]   ;;  %v2446_v49 = vld [vmem:[#allocation5 + $0x570] ss:$8 sps:$4 sm:$0xff]  }
  0x45   :  { %1654 = vmatpush1.bf16.msra.mxu1 %v2351_v30  ;;  %v2418_v21 = vld [vmem:[#allocation5 + $0x524] ss:$8 sps:$4 sm:$0xff]   ;;  %v2416_v23 = vld [vmem:[#allocation5 + $0x520] ss:$8 sps:$4 sm:$0xff]   ;;  %v2460_v55 = vld [vmem:[#allocation5 + $0x594] ss:$8 sps:$4 sm:$0xff]  }
  0x46   :  { %1826 = vmatpush1.bf16.msra.mxu0 %v2352_v31  ;;  %1655 = vmatprep.subr.bf16.mxu1 %v2353_v32  ;;  %v2427_v28 = vld [vmem:[#allocation5 + $0x144] ss:$8 sps:$4 sm:$0xff]   ;;  %v2425_v30 = vld [vmem:[#allocation5 + $0x140] ss:$8 sps:$4 sm:$0xff]   ;;  %v2433_v32 = vld [vmem:[#allocation5 + $0x154] ss:$8 sps:$4 sm:$0xff]  }
  0x47   :  { %1827 = vmatprep.subr.bf16.mxu0 %v2355_v33  ;;  %v2430_v29 = vld [vmem:[#allocation5 + $0x544] ss:$8 sps:$4 sm:$0xff]   ;;  %v2428_v31 = vld [vmem:[#allocation5 + $0x540] ss:$8 sps:$4 sm:$0xff]   ;;  %v2436_v33 = vld [vmem:[#allocation5 + $0x554] ss:$8 sps:$4 sm:$0xff]  }
  0x48   :  { %v2449_v52 = vld [vmem:[#allocation5 + $0x180] ss:$8 sps:$4 sm:$0xff]   ;;  %v2481_v6 = vld [vmem:[#allocation5 + $0x1d4] ss:$8 sps:$4 sm:$0xff]   ;;  %v2479_v8 = vld [vmem:[#allocation5 + $0x1d0] ss:$8 sps:$4 sm:$0xff]  }
  0x49   :  { %1656 = vmatpush1.bf16.msra.mxu1 %v2357_v34  ;;  %v2431_v34 = vld [vmem:[#allocation5 + $0x150] ss:$8 sps:$4 sm:$0xff]   ;;  %v2452_v53 = vld [vmem:[#allocation5 + $0x580] ss:$8 sps:$4 sm:$0xff]   ;;  %v2487_v10 = vld [vmem:[#allocation5 + $0x1e4] ss:$8 sps:$4 sm:$0xff]  }
  0x4a   :  { %1828 = vmatpush1.bf16.msra.mxu0 %v2358_v35  ;;  %1657 = vmatprep.subr.bf16.mxu1 %v2359_v36  ;;  %v2434_v35 = vld [vmem:[#allocation5 + $0x550] ss:$8 sps:$4 sm:$0xff]   ;;  %v2439_v36 = vld [vmem:[#allocation5 + $0x164] ss:$8 sps:$4 sm:$0xff]  }
  0x4b   :  { %1829 = vmatprep.subr.bf16.mxu0 %v2361_v37  ;;  %v2442_v37 = vld [vmem:[#allocation5 + $0x564] ss:$8 sps:$4 sm:$0xff]   ;;  %v2482_v9 = vld [vmem:[#allocation5 + $0x5d0] ss:$8 sps:$4 sm:$0xff]  }
  0x4d   :  { %1658 = vmatpush1.bf16.msra.mxu1 %v2363_v38  ;;  %v2437_v38 = vld [vmem:[#allocation5 + $0x160] ss:$8 sps:$4 sm:$0xff]  }
  0x4e   :  { %1830 = vmatpush1.bf16.msra.mxu0 %v2364_v39  ;;  %1659 = vmatprep.subr.bf16.mxu1 %v2365_v40  ;;  %v2440_v39 = vld [vmem:[#allocation5 + $0x560] ss:$8 sps:$4 sm:$0xff]   ;;  %v46_v40 = vld [vmem:[#allocation2 + $0x18] sm:$0xff] }
  0x4f   :  { %1831 = vmatprep.subr.bf16.mxu0 %v2367_v41  ;;  %v62_v41 = vld [vmem:[#allocation2 + $0x98] sm:$0xff] }
  0x51   :  { %1660 = vmatpush1.bf16.msra.mxu1 %v2369_v42  ;;  %v2445_v42 = vld [vmem:[#allocation5 + $0x174] ss:$8 sps:$4 sm:$0xff]  }
  0x52   :  { %1832 = vmatpush1.bf16.msra.mxu0 %v2370_v43  ;;  %1661 = vmatprep.subr.bf16.mxu1 %v2371_v44  ;;  %v2448_v43 = vld [vmem:[#allocation5 + $0x574] ss:$8 sps:$4 sm:$0xff]   ;;  %v78_v44 = vpack.c.bf16 %v62_v41, %v46_v40  ;;  %v2512_v40 = vld [vmem:[#allocation5 + $0x620] ss:$8 sps:$4 sm:$0xff]  }
  0x53   :  { %1833 = vmatprep.subr.bf16.mxu0 %v2373_v45  ;;  %v54_v45 = vld [vmem:[#allocation2 + $0x58] sm:$0xff] }
  0x55   :  { %1662 = vmatpush1.bf16.msra.mxu1 %v2375_v46  ;;  %v70_v46 = vld [vmem:[#allocation2 + $0xd8] sm:$0xff] }
  0x56   :  { %1834 = vmatpush1.bf16.msra.mxu0 %v2376_v47  ;;  %1663 = vmatprep.subr.bf16.mxu1 %v2377_v50  ;;  %v86_v47 = vpack.c.bf16 %v70_v46, %v54_v45  ;;  %v2451_v50 = vld [vmem:[#allocation5 + $0x184] ss:$8 sps:$4 sm:$0xff]   ;;  %v2518_v45 = vld [vmem:[#allocation5 + $0x630] ss:$8 sps:$4 sm:$0xff]  }
  0x57   :  { %1835 = vmatprep.subr.bf16.mxu0 %v2379_v51  ;;  %v2454_v51 = vld [vmem:[#allocation5 + $0x584] ss:$8 sps:$4 sm:$0xff]  }
  0x58   :  { %v2523_v46 = vld [vmem:[#allocation5 + $0x244] ss:$8 sps:$4 sm:$0xff]  }
  0x59   :  { %1664 = vmatpush1.bf16.msra.mxu1 %v2381_v56  ;;  %v2455_v56 = vld [vmem:[#allocation5 + $0x190] ss:$8 sps:$4 sm:$0xff]  }
  0x5a   :  { %1836 = vmatpush1.bf16.msra.mxu0 %v2382_v57  ;;  %1665 = vmatprep.subr.bf16.mxu1 %v2383_v58  ;;  %v2458_v57 = vld [vmem:[#allocation5 + $0x590] ss:$8 sps:$4 sm:$0xff]   ;;  %v2463_v58 = vld [vmem:[#allocation5 + $0x1a4] ss:$8 sps:$4 sm:$0xff]  }
  0x5b   :  { %1837 = vmatprep.subr.bf16.mxu0 %v2385_v59  ;;  %v2466_v59 = vld [vmem:[#allocation5 + $0x5a4] ss:$8 sps:$4 sm:$0xff]  }
  0x5d   :  { %1666 = vmatpush1.bf16.msra.mxu1 %v2387_v60  ;;  %v2461_v60 = vld [vmem:[#allocation5 + $0x1a0] ss:$8 sps:$4 sm:$0xff]  }
  0x5e   :  { %1838 = vmatpush1.bf16.msra.mxu0 %v2388_v61  ;;  %1667 = vmatprep.subr.bf16.mxu1 %v2389_v62  ;;  %v2464_v61 = vld [vmem:[#allocation5 + $0x5a0] ss:$8 sps:$4 sm:$0xff]   ;;  %v2469_v62 = vld [vmem:[#allocation5 + $0x1b4] ss:$8 sps:$4 sm:$0xff]  }
  0x5f   :  { %1839 = vmatprep.subr.bf16.mxu0 %v2391_v63  ;;  %v2472_v63 = vld [vmem:[#allocation5 + $0x5b4] ss:$8 sps:$4 sm:$0xff]  }
  0x61   :  { %1668 = vmatpush1.bf16.msra.mxu1 %v2393_v0  ;;  %v2467_v0 = vld [vmem:[#allocation5 + $0x1b0] ss:$8 sps:$4 sm:$0xff]  }
  0x62   :  { %1840 = vmatpush1.bf16.msra.mxu0 %v2394_v1  ;;  %1669 = vmatprep.subr.bf16.mxu1 %v2395_v2  ;;  %v2470_v1 = vld [vmem:[#allocation5 + $0x5b0] ss:$8 sps:$4 sm:$0xff]   ;;  %v2475_v2 = vld [vmem:[#allocation5 + $0x1c4] ss:$8 sps:$4 sm:$0xff]  }
  0x63   :  { %1841 = vmatprep.subr.bf16.mxu0 %v2397_v3  ;;  %v2478_v3 = vld [vmem:[#allocation5 + $0x5c4] ss:$8 sps:$4 sm:$0xff]  }
  0x65   :  { %1670 = vmatpush1.bf16.msra.mxu1 %v2399_v4  ;;  %v2473_v4 = vld [vmem:[#allocation5 + $0x1c0] ss:$8 sps:$4 sm:$0xff]  }
  0x66   :  { %1842 = vmatpush1.bf16.msra.mxu0 %v2400_v5  ;;  %1682 = vmatprep.subr.bf16.mxu1 %v2403_v7  ;;  %v2476_v5 = vld [vmem:[#allocation5 + $0x5c0] ss:$8 sps:$4 sm:$0xff]   ;;  %v2484_v7 = vld [vmem:[#allocation5 + $0x5d4] ss:$8 sps:$4 sm:$0xff]  }
  0x67   :  { %1854 = vmatprep.subr.bf16.mxu0 %v2406_v11  ;;  %v2490_v11 = vld [vmem:[#allocation5 + $0x5e4] ss:$8 sps:$4 sm:$0xff]  }
  0x68   :  { %1672 = vmatmul.mubr.bf16.vlgmr.msra.gmra.mrb[0].mxu1 %v75_v14  ;;  %v2493_v14 = vld [vmem:[#allocation5 + $0x1f4] ss:$8 sps:$4 sm:$0xff]  }
  0x69   :  { %1844 = vmatmul.mubr.bf16.vlgmr.msra.gmra.mrb[0].mxu0 %v83_v15  ;;  %1683 = vmatpush1.bf16.msra.mxu1 %v2401_v12  ;;  %v2485_v12 = vld [vmem:[#allocation5 + $0x1e0] ss:$8 sps:$4 sm:$0xff]   ;;  %v2496_v15 = vld [vmem:[#allocation5 + $0x5f4] ss:$8 sps:$4 sm:$0xff]  }
  0x6a   :  { %1855 = vmatpush1.bf16.msra.mxu0 %v2404_v13  ;;  %1684 = vmatprep.subr.bf16.mxu1 %v2409_v16  ;;  %v2488_v13 = vld [vmem:[#allocation5 + $0x5e0] ss:$8 sps:$4 sm:$0xff]   ;;  %v2491_v16 = vld [vmem:[#allocation5 + $0x1f0] ss:$8 sps:$4 sm:$0xff]  }
  0x6b   :  { %1856 = vmatprep.subr.bf16.mxu0 %v2412_v17  ;;  %1714 = vmatprep.mubr.bf16.mxu1 %v78_v44  ;;  %v2494_v17 = vld [vmem:[#allocation5 + $0x5f0] ss:$8 sps:$4 sm:$0xff]  }
  0x6c   :  { %1886 = vmatprep.mubr.bf16.mxu0 %v86_v47  ;;  %v2515_v44 = vld [vmem:[#allocation5 + $0x230] ss:$8 sps:$4 sm:$0xff]   ;;  %v2526_v47 = vld [vmem:[#allocation5 + $0x644] ss:$8 sps:$4 sm:$0xff]  }
  0x6d   :  { %1685 = vmatpush1.bf16.msra.mxu1 %v2407_v18  ;;  %v45_v18 = vld [vmem:[#allocation2 + $0x10] sm:$0xff] }
  0x6e   :  { %1857 = vmatpush1.bf16.msra.mxu0 %v2410_v19  ;;  %1686 = vmatprep.subr.bf16.mxu1 %v2415_v20  ;;  %v2499_v19 = vld [vmem:[#allocation5 + $0x204] ss:$8 sps:$4 sm:$0xff]   ;;  %v61_v20 = vld [vmem:[#allocation2 + $0x90] sm:$0xff] }
  0x6f   :  { %1858 = vmatprep.subr.bf16.mxu0 %v2418_v21  ;;  %v53_v21 = vld [vmem:[#allocation2 + $0x50] sm:$0xff] }
  0x71   :  { %1687 = vmatpush1.bf16.msra.mxu1 %v2413_v22  ;;  %v69_v22 = vld [vmem:[#allocation2 + $0xd0] sm:$0xff] }
  0x72   :  { %1859 = vmatpush1.bf16.msra.mxu0 %v2416_v23  ;;  %1688 = vmatprep.subr.bf16.mxu1 %v2421_v24  ;;  %v2502_v23 = vld [vmem:[#allocation5 + $0x604] ss:$8 sps:$4 sm:$0xff]   ;;  %v2497_v24 = vld [vmem:[#allocation5 + $0x200] ss:$8 sps:$4 sm:$0xff]  }
  0x73   :  { %1860 = vmatprep.subr.bf16.mxu0 %v2424_v25  ;;  %v2500_v25 = vld [vmem:[#allocation5 + $0x600] ss:$8 sps:$4 sm:$0xff]  }
  0x75   :  { %1689 = vmatpush1.bf16.msra.mxu1 %v2419_v26  ;;  %v77_v26 = vpack.c.bf16 %v61_v20, %v45_v18  ;;  %v2577_v18 = vld [vmem:[#allocation5 + $0x2d4] ss:$8 sps:$4 sm:$0xff]   ;;  %v2575_v20 = vld [vmem:[#allocation5 + $0x2d0] ss:$8 sps:$4 sm:$0xff]  }
  0x76   :  { %1861 = vmatpush1.bf16.msra.mxu0 %v2422_v27  ;;  %1690 = vmatprep.subr.bf16.mxu1 %v2427_v28  ;;  %v85_v27 = vpack.c.bf16 %v69_v22, %v53_v21  ;;  %v2505_v28 = vld [vmem:[#allocation5 + $0x214] ss:$8 sps:$4 sm:$0xff]   ;;  %v2578_v21 = vld [vmem:[#allocation5 + $0x6d0] ss:$8 sps:$4 sm:$0xff]   ;;  %v2583_v22 = vld [vmem:[#allocation5 + $0x2e4] ss:$8 sps:$4 sm:$0xff]  }
  0x77   :  { %1862 = vmatprep.subr.bf16.mxu0 %v2430_v29  ;;  %v2508_v29 = vld [vmem:[#allocation5 + $0x614] ss:$8 sps:$4 sm:$0xff]  }
  0x79   :  { %1691 = vmatpush1.bf16.msra.mxu1 %v2425_v30  ;;  %v2503_v30 = vld [vmem:[#allocation5 + $0x210] ss:$8 sps:$4 sm:$0xff]  }
  0x7a   :  { %1863 = vmatpush1.bf16.msra.mxu0 %v2428_v31  ;;  %1692 = vmatprep.subr.bf16.mxu1 %v2433_v32  ;;  %v2506_v31 = vld [vmem:[#allocation5 + $0x610] ss:$8 sps:$4 sm:$0xff]   ;;  %v2511_v32 = vld [vmem:[#allocation5 + $0x224] ss:$8 sps:$4 sm:$0xff]  }
  0x7b   :  { %1864 = vmatprep.subr.bf16.mxu0 %v2436_v33  ;;  %v2514_v33 = vld [vmem:[#allocation5 + $0x624] ss:$8 sps:$4 sm:$0xff]  }
  0x7d   :  { %1693 = vmatpush1.bf16.msra.mxu1 %v2431_v34  ;;  %v48_v34 = vld [vmem:[#allocation2 + $0x28] sm:$0xff] }
  0x7e   :  { %1865 = vmatpush1.bf16.msra.mxu0 %v2434_v35  ;;  %1694 = vmatprep.subr.bf16.mxu1 %v2439_v36  ;;  %v64_v35 = vld [vmem:[#allocation2 + $0xa8] sm:$0xff] }
  0x7f   :  { %1866 = vmatprep.subr.bf16.mxu0 %v2442_v37  ;;  %v80_v36 = vpack.c.bf16 %v64_v35, %v48_v34  ;;  %v2509_v37 = vld [vmem:[#allocation5 + $0x220] ss:$8 sps:$4 sm:$0xff]   ;;  %v2595_v34 = vld [vmem:[#allocation5 + $0x304] ss:$8 sps:$4 sm:$0xff]  }
  0x80   :  { %v2598_v35 = vld [vmem:[#allocation5 + $0x704] ss:$8 sps:$4 sm:$0xff]  }
  0x81   :  { %1695 = vmatpush1.bf16.msra.mxu1 %v2437_v38  ;;  %v56_v38 = vld [vmem:[#allocation2 + $0x68] sm:$0xff] }
  0x82   :  { %1867 = vmatpush1.bf16.msra.mxu0 %v2440_v39  ;;  %1696 = vmatprep.subr.bf16.mxu1 %v2445_v42  ;;  %v72_v39 = vld [vmem:[#allocation2 + $0xe8] sm:$0xff]  ;;  %v2517_v42 = vld [vmem:[#allocation5 + $0x234] ss:$8 sps:$4 sm:$0xff]  }
  0x83   :  { %1868 = vmatprep.subr.bf16.mxu0 %v2448_v43  ;;  %v88_v41 = vpack.c.bf16 %v72_v39, %v56_v38  ;;  %v2520_v43 = vld [vmem:[#allocation5 + $0x634] ss:$8 sps:$4 sm:$0xff]  }
  0x84   :  { %v66_v39 = vld [vmem:[#allocation2 + $0xb8] sm:$0xff] }
  0x85   :  { %1697 = vmatpush1.bf16.msra.mxu1 %v2443_v48  ;;  %v2521_v48 = vld [vmem:[#allocation5 + $0x240] ss:$8 sps:$4 sm:$0xff]  }
  0x86   :  { %1869 = vmatpush1.bf16.msra.mxu0 %v2446_v49  ;;  %1698 = vmatprep.subr.bf16.mxu1 %v2451_v50  ;;  %v2524_v49 = vld [vmem:[#allocation5 + $0x640] ss:$8 sps:$4 sm:$0xff]   ;;  %v2529_v50 = vld [vmem:[#allocation5 + $0x254] ss:$8 sps:$4 sm:$0xff]  }
  0x87   :  { %1870 = vmatprep.subr.bf16.mxu0 %v2454_v51  ;;  %v2532_v51 = vld [vmem:[#allocation5 + $0x654] ss:$8 sps:$4 sm:$0xff]  }
  0x89   :  { %1699 = vmatpush1.bf16.msra.mxu1 %v2449_v52  ;;  %v2527_v52 = vld [vmem:[#allocation5 + $0x250] ss:$8 sps:$4 sm:$0xff]  }
  0x8a   :  { %1871 = vmatpush1.bf16.msra.mxu0 %v2452_v53  ;;  %1700 = vmatprep.subr.bf16.mxu1 %v2457_v54  ;;  %v2530_v53 = vld [vmem:[#allocation5 + $0x650] ss:$8 sps:$4 sm:$0xff]   ;;  %v2535_v54 = vld [vmem:[#allocation5 + $0x264] ss:$8 sps:$4 sm:$0xff]  }
  0x8b   :  { %1872 = vmatprep.subr.bf16.mxu0 %v2460_v55  ;;  %v2538_v55 = vld [vmem:[#allocation5 + $0x664] ss:$8 sps:$4 sm:$0xff]  }
  0x8d   :  { %1701 = vmatpush1.bf16.msra.mxu1 %v2455_v56  ;;  %v2533_v56 = vld [vmem:[#allocation5 + $0x260] ss:$8 sps:$4 sm:$0xff]  }
  0x8e   :  { %1873 = vmatpush1.bf16.msra.mxu0 %v2458_v57  ;;  %1702 = vmatprep.subr.bf16.mxu1 %v2463_v58  ;;  %v2536_v57 = vld [vmem:[#allocation5 + $0x660] ss:$8 sps:$4 sm:$0xff]   ;;  %v2541_v58 = vld [vmem:[#allocation5 + $0x274] ss:$8 sps:$4 sm:$0xff]  }
  0x8f   :  { %1874 = vmatprep.subr.bf16.mxu0 %v2466_v59  ;;  %v2544_v59 = vld [vmem:[#allocation5 + $0x674] ss:$8 sps:$4 sm:$0xff]  }
  0x91   :  { %1703 = vmatpush1.bf16.msra.mxu1 %v2461_v60  ;;  %v2539_v60 = vld [vmem:[#allocation5 + $0x270] ss:$8 sps:$4 sm:$0xff]  }
  0x92   :  { %1875 = vmatpush1.bf16.msra.mxu0 %v2464_v61  ;;  %1704 = vmatprep.subr.bf16.mxu1 %v2469_v62  ;;  %v2542_v61 = vld [vmem:[#allocation5 + $0x670] ss:$8 sps:$4 sm:$0xff]   ;;  %v2547_v62 = vld [vmem:[#allocation5 + $0x284] ss:$8 sps:$4 sm:$0xff]  }
  0x93   :  { %1876 = vmatprep.subr.bf16.mxu0 %v2472_v63  ;;  %v2550_v63 = vld [vmem:[#allocation5 + $0x684] ss:$8 sps:$4 sm:$0xff]  }
  0x95   :  { %1705 = vmatpush1.bf16.msra.mxu1 %v2467_v0  ;;  %v2545_v0 = vld [vmem:[#allocation5 + $0x280] ss:$8 sps:$4 sm:$0xff]  }
  0x96   :  { %1877 = vmatpush1.bf16.msra.mxu0 %v2470_v1  ;;  %1706 = vmatprep.subr.bf16.mxu1 %v2475_v2  ;;  %v2548_v1 = vld [vmem:[#allocation5 + $0x680] ss:$8 sps:$4 sm:$0xff]   ;;  %v2553_v2 = vld [vmem:[#allocation5 + $0x294] ss:$8 sps:$4 sm:$0xff]  }
  0x97   :  { %1878 = vmatprep.subr.bf16.mxu0 %v2478_v3  ;;  %v2556_v3 = vld [vmem:[#allocation5 + $0x694] ss:$8 sps:$4 sm:$0xff]  }
  0x99   :  { %1707 = vmatpush1.bf16.msra.mxu1 %v2473_v4  ;;  %v2551_v4 = vld [vmem:[#allocation5 + $0x290] ss:$8 sps:$4 sm:$0xff]  }
  0x9a   :  { %1879 = vmatpush1.bf16.msra.mxu0 %v2476_v5  ;;  %1708 = vmatprep.subr.bf16.mxu1 %v2481_v6  ;;  %v2554_v5 = vld [vmem:[#allocation5 + $0x690] ss:$8 sps:$4 sm:$0xff]   ;;  %v2559_v6 = vld [vmem:[#allocation5 + $0x2a4] ss:$8 sps:$4 sm:$0xff]  }
  0x9b   :  { %1880 = vmatprep.subr.bf16.mxu0 %v2484_v7  ;;  %v2562_v7 = vld [vmem:[#allocation5 + $0x6a4] ss:$8 sps:$4 sm:$0xff]  }
  0x9d   :  { %1709 = vmatpush1.bf16.msra.mxu1 %v2479_v8  ;;  %v2557_v8 = vld [vmem:[#allocation5 + $0x2a0] ss:$8 sps:$4 sm:$0xff]  }
  0x9e   :  { %1881 = vmatpush1.bf16.msra.mxu0 %v2482_v9  ;;  %1710 = vmatprep.subr.bf16.mxu1 %v2487_v10  ;;  %v2560_v9 = vld [vmem:[#allocation5 + $0x6a0] ss:$8 sps:$4 sm:$0xff]   ;;  %v2565_v10 = vld [vmem:[#allocation5 + $0x2b4] ss:$8 sps:$4 sm:$0xff]  }
  0x9f   :  { %1882 = vmatprep.subr.bf16.mxu0 %v2490_v11  ;;  %v2568_v11 = vld [vmem:[#allocation5 + $0x6b4] ss:$8 sps:$4 sm:$0xff]  }
  0xa1   :  { %1711 = vmatpush1.bf16.msra.mxu1 %v2485_v12  ;;  %v2563_v12 = vld [vmem:[#allocation5 + $0x2b0] ss:$8 sps:$4 sm:$0xff]  }
  0xa2   :  { %1883 = vmatpush1.bf16.msra.mxu0 %v2488_v13  ;;  %1712 = vmatprep.subr.bf16.mxu1 %v2493_v14  ;;  %v2566_v13 = vld [vmem:[#allocation5 + $0x6b0] ss:$8 sps:$4 sm:$0xff]   ;;  %v2571_v14 = vld [vmem:[#allocation5 + $0x2c4] ss:$8 sps:$4 sm:$0xff]  }
  0xa3   :  { %1884 = vmatprep.subr.bf16.mxu0 %v2496_v15  ;;  %v2574_v15 = vld [vmem:[#allocation5 + $0x6c4] ss:$8 sps:$4 sm:$0xff]  }
  0xa5   :  { %1713 = vmatpush1.bf16.msra.mxu1 %v2491_v16  ;;  %v2569_v16 = vld [vmem:[#allocation5 + $0x2c0] ss:$8 sps:$4 sm:$0xff]  }
  0xa6   :  { %1885 = vmatpush1.bf16.msra.mxu0 %v2494_v17  ;;  %1725 = vmatprep.subr.bf16.mxu1 %v2499_v19  ;;  %v2572_v17 = vld [vmem:[#allocation5 + $0x6c0] ss:$8 sps:$4 sm:$0xff]   ;;  %v2580_v19 = vld [vmem:[#allocation5 + $0x6d4] ss:$8 sps:$4 sm:$0xff]  }
  0xa7   :  { %1897 = vmatprep.subr.bf16.mxu0 %v2502_v23  ;;  %v2586_v23 = vld [vmem:[#allocation5 + $0x6e4] ss:$8 sps:$4 sm:$0xff]  }
  0xa8   :  { %1715 = vmatmul.mubr.bf16.vlgmr.msra.gmra.mrb[0].mxu1 %v77_v26  ;;  %v2589_v26 = vld [vmem:[#allocation5 + $0x2f4] ss:$8 sps:$4 sm:$0xff]  }
  0xa9   :  { %1887 = vmatmul.mubr.bf16.vlgmr.msra.gmra.mrb[0].mxu0 %v85_v27  ;;  %1726 = vmatpush1.bf16.msra.mxu1 %v2497_v24  ;;  %v2581_v24 = vld [vmem:[#allocation5 + $0x2e0] ss:$8 sps:$4 sm:$0xff]   ;;  %v2592_v27 = vld [vmem:[#allocation5 + $0x6f4] ss:$8 sps:$4 sm:$0xff]  }
  0xaa   :  { %1898 = vmatpush1.bf16.msra.mxu0 %v2500_v25  ;;  %1727 = vmatprep.subr.bf16.mxu1 %v2505_v28  ;;  %v2584_v25 = vld [vmem:[#allocation5 + $0x6e0] ss:$8 sps:$4 sm:$0xff]   ;;  %v2587_v28 = vld [vmem:[#allocation5 + $0x2f0] ss:$8 sps:$4 sm:$0xff]  }
  0xab   :  { %1899 = vmatprep.subr.bf16.mxu0 %v2508_v29  ;;  %1757 = vmatprep.mubr.bf16.mxu1 %v80_v36  ;;  %v2590_v29 = vld [vmem:[#allocation5 + $0x6f0] ss:$8 sps:$4 sm:$0xff]  }
  0xac   :  { %1929 = vmatprep.mubr.bf16.mxu0 %v88_v41  ;;  %v50_v36 = vld [vmem:[#allocation2 + $0x38] sm:$0xff] }
  0xad   :  { %1728 = vmatpush1.bf16.msra.mxu1 %v2503_v30  ;;  %v47_v30 = vld [vmem:[#allocation2 + $0x20] sm:$0xff]  ;;  %v74_v41 = vld [vmem:[#allocation2 + $0xf8] sm:$0xff] }
  0xae   :  { %1900 = vmatpush1.bf16.msra.mxu0 %v2506_v31  ;;  %1729 = vmatprep.subr.bf16.mxu1 %v2511_v32  ;;  %v63_v31 = vld [vmem:[#allocation2 + $0xa0] sm:$0xff] }
  0xaf   :  { %1901 = vmatprep.subr.bf16.mxu0 %v2514_v33  ;;  %v55_v32 = vld [vmem:[#allocation2 + $0x60] sm:$0xff] }
  0xb0   :  { %v71_v33 = vld [vmem:[#allocation2 + $0xe0] sm:$0xff] }
  0xb1   :  { %1730 = vmatpush1.bf16.msra.mxu1 %v2509_v37  ;;  %v79_v37 = vpack.c.bf16 %v63_v31, %v47_v30  ;;  %v87_v38 = vpack.c.bf16 %v71_v33, %v55_v32  ;;  %v2673_v30 = vld [vmem:[#allocation5 + $0x3d4] ss:$8 sps:$4 sm:$0xff]   ;;  %v2671_v32 = vld [vmem:[#allocation5 + $0x3d0] ss:$8 sps:$4 sm:$0xff]  }
  0xb2   :  { %1902 = vmatpush1.bf16.msra.mxu0 %v2512_v40  ;;  %1731 = vmatprep.subr.bf16.mxu1 %v2517_v42  ;;  %v58_v40 = vld [vmem:[#allocation2 + $0x78] sm:$0xff]  ;;  %v2593_v42 = vld [vmem:[#allocation5 + $0x300] ss:$8 sps:$4 sm:$0xff]  }
  0xb3   :  { %1903 = vmatprep.subr.bf16.mxu0 %v2520_v43  ;;  %v2596_v43 = vld [vmem:[#allocation5 + $0x700] ss:$8 sps:$4 sm:$0xff]   ;;  %v2676_v31 = vld [vmem:[#allocation5 + $0x7d4] ss:$8 sps:$4 sm:$0xff]   ;;  %v2674_v33 = vld [vmem:[#allocation5 + $0x7d0] ss:$8 sps:$4 sm:$0xff]  }
  0xb5   :  { %1732 = vmatpush1.bf16.msra.mxu1 %v2515_v44  ;;  %v2601_v44 = vld [vmem:[#allocation5 + $0x314] ss:$8 sps:$4 sm:$0xff]  }
  0xb6   :  { %1904 = vmatpush1.bf16.msra.mxu0 %v2518_v45  ;;  %1733 = vmatprep.subr.bf16.mxu1 %v2523_v46  ;;  %v2604_v45 = vld [vmem:[#allocation5 + $0x714] ss:$8 sps:$4 sm:$0xff]   ;;  %v82_v46 = vpack.c.bf16 %v66_v39, %v50_v36  ;;  %v2677_v36 = vld [vmem:[#allocation5 + $0x3e0] ss:$8 sps:$4 sm:$0xff]  }
  0xb7   :  { %1905 = vmatprep.subr.bf16.mxu0 %v2526_v47  ;;  %v90_v47 = vpack.c.bf16 %v74_v41, %v58_v40  ;;  %v2688_v39 = vld [vmem:[#allocation5 + $0x7f4] ss:$8 sps:$4 sm:$0xff]   ;;  %v2683_v40 = vld [vmem:[#allocation5 + $0x3f0] ss:$8 sps:$4 sm:$0xff]  }
  0xb8   :  { %v2686_v41 = vld [vmem:[#allocation5 + $0x7f0] ss:$8 sps:$4 sm:$0xff]  }
  0xb9   :  { %1734 = vmatpush1.bf16.msra.mxu1 %v2521_v48  ;;  %v2599_v48 = vld [vmem:[#allocation5 + $0x310] ss:$8 sps:$4 sm:$0xff]  }
  0xba   :  { %1906 = vmatpush1.bf16.msra.mxu0 %v2524_v49  ;;  %1735 = vmatprep.subr.bf16.mxu1 %v2529_v50  ;;  %v2602_v49 = vld [vmem:[#allocation5 + $0x710] ss:$8 sps:$4 sm:$0xff]   ;;  %v2607_v50 = vld [vmem:[#allocation5 + $0x324] ss:$8 sps:$4 sm:$0xff]  }
  0xbb   :  { %1907 = vmatprep.subr.bf16.mxu0 %v2532_v51  ;;  %v2610_v51 = vld [vmem:[#allocation5 + $0x724] ss:$8 sps:$4 sm:$0xff]  }
  0xbd   :  { %1736 = vmatpush1.bf16.msra.mxu1 %v2527_v52  ;;  %v2605_v52 = vld [vmem:[#allocation5 + $0x320] ss:$8 sps:$4 sm:$0xff]  }
  0xbe   :  { %1908 = vmatpush1.bf16.msra.mxu0 %v2530_v53  ;;  %1737 = vmatprep.subr.bf16.mxu1 %v2535_v54  ;;  %v2608_v53 = vld [vmem:[#allocation5 + $0x720] ss:$8 sps:$4 sm:$0xff]   ;;  %v2613_v54 = vld [vmem:[#allocation5 + $0x334] ss:$8 sps:$4 sm:$0xff]  }
  0xbf   :  { %1909 = vmatprep.subr.bf16.mxu0 %v2538_v55  ;;  %v2616_v55 = vld [vmem:[#allocation5 + $0x734] ss:$8 sps:$4 sm:$0xff]  }
  0xc1   :  { %1738 = vmatpush1.bf16.msra.mxu1 %v2533_v56  ;;  %v2611_v56 = vld [vmem:[#allocation5 + $0x330] ss:$8 sps:$4 sm:$0xff]  }
  0xc2   :  { %1910 = vmatpush1.bf16.msra.mxu0 %v2536_v57  ;;  %1739 = vmatprep.subr.bf16.mxu1 %v2541_v58  ;;  %v2614_v57 = vld [vmem:[#allocation5 + $0x730] ss:$8 sps:$4 sm:$0xff]   ;;  %v2619_v58 = vld [vmem:[#allocation5 + $0x344] ss:$8 sps:$4 sm:$0xff]  }
  0xc3   :  { %1911 = vmatprep.subr.bf16.mxu0 %v2544_v59  ;;  %v2622_v59 = vld [vmem:[#allocation5 + $0x744] ss:$8 sps:$4 sm:$0xff]  }
  0xc5   :  { %1740 = vmatpush1.bf16.msra.mxu1 %v2539_v60  ;;  %v2617_v60 = vld [vmem:[#allocation5 + $0x340] ss:$8 sps:$4 sm:$0xff]  }
  0xc6   :  { %1912 = vmatpush1.bf16.msra.mxu0 %v2542_v61  ;;  %1741 = vmatprep.subr.bf16.mxu1 %v2547_v62  ;;  %v2620_v61 = vld [vmem:[#allocation5 + $0x740] ss:$8 sps:$4 sm:$0xff]   ;;  %v2625_v62 = vld [vmem:[#allocation5 + $0x354] ss:$8 sps:$4 sm:$0xff]  }
  0xc7   :  { %1913 = vmatprep.subr.bf16.mxu0 %v2550_v63  ;;  %v2628_v63 = vld [vmem:[#allocation5 + $0x754] ss:$8 sps:$4 sm:$0xff]  }
  0xc9   :  { %1742 = vmatpush1.bf16.msra.mxu1 %v2545_v0  ;;  %v2623_v0 = vld [vmem:[#allocation5 + $0x350] ss:$8 sps:$4 sm:$0xff]  }
  0xca   :  { %1914 = vmatpush1.bf16.msra.mxu0 %v2548_v1  ;;  %1743 = vmatprep.subr.bf16.mxu1 %v2553_v2  ;;  %v2626_v1 = vld [vmem:[#allocation5 + $0x750] ss:$8 sps:$4 sm:$0xff]   ;;  %v2631_v2 = vld [vmem:[#allocation5 + $0x364] ss:$8 sps:$4 sm:$0xff]  }
  0xcb   :  { %1915 = vmatprep.subr.bf16.mxu0 %v2556_v3  ;;  %v2634_v3 = vld [vmem:[#allocation5 + $0x764] ss:$8 sps:$4 sm:$0xff]  }
  0xcd   :  { %1744 = vmatpush1.bf16.msra.mxu1 %v2551_v4  ;;  %v2629_v4 = vld [vmem:[#allocation5 + $0x360] ss:$8 sps:$4 sm:$0xff]  }
  0xce   :  { %1916 = vmatpush1.bf16.msra.mxu0 %v2554_v5  ;;  %1745 = vmatprep.subr.bf16.mxu1 %v2559_v6  ;;  %v2632_v5 = vld [vmem:[#allocation5 + $0x760] ss:$8 sps:$4 sm:$0xff]   ;;  %v2637_v6 = vld [vmem:[#allocation5 + $0x374] ss:$8 sps:$4 sm:$0xff]  }
  0xcf   :  { %1917 = vmatprep.subr.bf16.mxu0 %v2562_v7  ;;  %v2640_v7 = vld [vmem:[#allocation5 + $0x774] ss:$8 sps:$4 sm:$0xff]  }
  0xd1   :  { %1746 = vmatpush1.bf16.msra.mxu1 %v2557_v8  ;;  %v2635_v8 = vld [vmem:[#allocation5 + $0x370] ss:$8 sps:$4 sm:$0xff]  }
  0xd2   :  { %1918 = vmatpush1.bf16.msra.mxu0 %v2560_v9  ;;  %1747 = vmatprep.subr.bf16.mxu1 %v2565_v10  ;;  %v2638_v9 = vld [vmem:[#allocation5 + $0x770] ss:$8 sps:$4 sm:$0xff]   ;;  %v2643_v10 = vld [vmem:[#allocation5 + $0x384] ss:$8 sps:$4 sm:$0xff]  }
  0xd3   :  { %1919 = vmatprep.subr.bf16.mxu0 %v2568_v11  ;;  %v2646_v11 = vld [vmem:[#allocation5 + $0x784] ss:$8 sps:$4 sm:$0xff]  }
  0xd5   :  { %1748 = vmatpush1.bf16.msra.mxu1 %v2563_v12  ;;  %v2641_v12 = vld [vmem:[#allocation5 + $0x380] ss:$8 sps:$4 sm:$0xff]  }
  0xd6   :  { %1920 = vmatpush1.bf16.msra.mxu0 %v2566_v13  ;;  %1749 = vmatprep.subr.bf16.mxu1 %v2571_v14  ;;  %v2644_v13 = vld [vmem:[#allocation5 + $0x780] ss:$8 sps:$4 sm:$0xff]   ;;  %v2649_v14 = vld [vmem:[#allocation5 + $0x394] ss:$8 sps:$4 sm:$0xff]  }
  0xd7   :  { %1921 = vmatprep.subr.bf16.mxu0 %v2574_v15  ;;  %v2652_v15 = vld [vmem:[#allocation5 + $0x794] ss:$8 sps:$4 sm:$0xff]  }
  0xd9   :  { %1750 = vmatpush1.bf16.msra.mxu1 %v2569_v16  ;;  %v2647_v16 = vld [vmem:[#allocation5 + $0x390] ss:$8 sps:$4 sm:$0xff]  }
  0xda   :  { %1922 = vmatpush1.bf16.msra.mxu0 %v2572_v17  ;;  %1751 = vmatprep.subr.bf16.mxu1 %v2577_v18  ;;  %v2650_v17 = vld [vmem:[#allocation5 + $0x790] ss:$8 sps:$4 sm:$0xff]   ;;  %v2655_v18 = vld [vmem:[#allocation5 + $0x3a4] ss:$8 sps:$4 sm:$0xff]  }
  0xdb   :  { %1923 = vmatprep.subr.bf16.mxu0 %v2580_v19  ;;  %v2658_v19 = vld [vmem:[#allocation5 + $0x7a4] ss:$8 sps:$4 sm:$0xff]  }
  0xdd   :  { %1752 = vmatpush1.bf16.msra.mxu1 %v2575_v20  ;;  %v2653_v20 = vld [vmem:[#allocation5 + $0x3a0] ss:$8 sps:$4 sm:$0xff]  }
  0xde   :  { %1924 = vmatpush1.bf16.msra.mxu0 %v2578_v21  ;;  %1753 = vmatprep.subr.bf16.mxu1 %v2583_v22  ;;  %v2656_v21 = vld [vmem:[#allocation5 + $0x7a0] ss:$8 sps:$4 sm:$0xff]   ;;  %v2661_v22 = vld [vmem:[#allocation5 + $0x3b4] ss:$8 sps:$4 sm:$0xff]  }
  0xdf   :  { %1925 = vmatprep.subr.bf16.mxu0 %v2586_v23  ;;  %v2664_v23 = vld [vmem:[#allocation5 + $0x7b4] ss:$8 sps:$4 sm:$0xff]  }
  0xe1   :  { %1754 = vmatpush1.bf16.msra.mxu1 %v2581_v24  ;;  %v2659_v24 = vld [vmem:[#allocation5 + $0x3b0] ss:$8 sps:$4 sm:$0xff]  }
  0xe2   :  { %1926 = vmatpush1.bf16.msra.mxu0 %v2584_v25  ;;  %1755 = vmatprep.subr.bf16.mxu1 %v2589_v26  ;;  %v2662_v25 = vld [vmem:[#allocation5 + $0x7b0] ss:$8 sps:$4 sm:$0xff]   ;;  %v2667_v26 = vld [vmem:[#allocation5 + $0x3c4] ss:$8 sps:$4 sm:$0xff]  }
  0xe3   :  { %1927 = vmatprep.subr.bf16.mxu0 %v2592_v27  ;;  %v2670_v27 = vld [vmem:[#allocation5 + $0x7c4] ss:$8 sps:$4 sm:$0xff]  }
  0xe5   :  { %1756 = vmatpush1.bf16.msra.mxu1 %v2587_v28  ;;  %v2665_v28 = vld [vmem:[#allocation5 + $0x3c0] ss:$8 sps:$4 sm:$0xff]  }
  0xe6   :  { %1928 = vmatpush1.bf16.msra.mxu0 %v2590_v29  ;;  %1768 = vmatprep.subr.bf16.mxu1 %v2595_v34  ;;  %v2668_v29 = vld [vmem:[#allocation5 + $0x7c0] ss:$8 sps:$4 sm:$0xff]   ;;  %v2679_v34 = vld [vmem:[#allocation5 + $0x3e4] ss:$8 sps:$4 sm:$0xff]  }
  0xe7   :  { %1940 = vmatprep.subr.bf16.mxu0 %v2598_v35  ;;  %v2682_v35 = vld [vmem:[#allocation5 + $0x7e4] ss:$8 sps:$4 sm:$0xff]  }
  0xe8   :  { %1758 = vmatmul.mubr.bf16.vlgmr.msra.gmra.mrb[0].mxu1 %v79_v37  ;;  %v2680_v37 = vld [vmem:[#allocation5 + $0x7e0] ss:$8 sps:$4 sm:$0xff]  }
  0xe9   :  { %1930 = vmatmul.mubr.bf16.vlgmr.msra.gmra.mrb[0].mxu0 %v87_v38  ;;  %1769 = vmatpush1.bf16.msra.mxu1 %v2593_v42  ;;  %v2685_v38 = vld [vmem:[#allocation5 + $0x3f4] ss:$8 sps:$4 sm:$0xff]  }
  0xea   :  { %1941 = vmatpush1.bf16.msra.mxu0 %v2596_v43  ;;  %1770 = vmatprep.subr.bf16.mxu1 %v2601_v44  ;;  %v49_v42 = vld [vmem:[#allocation2 + $0x30] sm:$0xff] }
  0xeb   :  { %1942 = vmatprep.subr.bf16.mxu0 %v2604_v45  ;;  %1800 = vmatprep.mubr.bf16.mxu1 %v82_v46  ;;  %v65_v43 = vld [vmem:[#allocation2 + $0xb0] sm:$0xff] }
  0xec   :  { %1972 = vmatprep.mubr.bf16.mxu0 %v90_v47  ;;  %v57_v44 = vld [vmem:[#allocation2 + $0x70] sm:$0xff]  ;;  %v81_v46 = vpack.c.bf16 %v65_v43, %v49_v42 }
  0xed   :  { %1771 = vmatpush1.bf16.msra.mxu1 %v2599_v48  ;;  %v73_v45 = vld [vmem:[#allocation2 + $0xf0] sm:$0xff]  ;;  %v349_v48 = vlaneseq }
  0xee   :  { %1943 = vmatpush1.bf16.msra.mxu0 %v2602_v49  ;;  %1772 = vmatprep.subr.bf16.mxu1 %v2607_v50  ;;  %v89_v47 = vpack.c.bf16 %v73_v45, %v57_v44 }
  0xef   :  { %1944 = vmatprep.subr.bf16.mxu0 %v2610_v51  ;;  %v350_v49 = vshrl.u32 %v349_v48, 7  ;;  %v347_v51 = vld [vmem:[%s2830_s2] sm:$0x3]  ;;  %s2733_s2 = scalar_lea.vmem %s1997_s13, 512 }
  0xf0   :  { %p2734_p2 = scmp.ne.s32.totalorder %s1997_s13, %s2733_s2  ;;  %p2739_p4 = scmp.lt.s32.totalorder %s2733_s2, %s2733_s2 }
  0xf1   :  { %1773 = vmatpush1.bf16.msra.mxu1 %v2605_v52  ;;  %v351_v50 = vsub.s32 0, %v350_v49  ;;  %v355_v52 = vsub.s32 1, %v350_v49 }
  0xf2   :  { %1945 = vmatpush1.bf16.msra.mxu0 %v2608_v53  ;;  %1774 = vmatprep.subr.bf16.mxu1 %v2613_v54  ;;  %p2740_p5 = por %p2739_p4, %p2738_p3 }
  0xf3   :  { %1946 = vmatprep.subr.bf16.mxu0 %v2616_v55  ;;  %v352_v53 = vrot.slane %v347_v51, %v351_v50  ;;  %v356_v54 = vrot.slane %v347_v51, %v355_v52 }
  0xf4   :  { %p2741_p6 = pnand %p2740_p5, %p2734_p2 }
  0xf5   :  { %1775 = vmatpush1.bf16.msra.mxu1 %v2611_v56 }
  0xf6   :  { %1947 = vmatpush1.bf16.msra.mxu0 %v2614_v57  ;;  %1776 = vmatprep.subr.bf16.mxu1 %v2619_v58 }
  0xf7   :  { %1948 = vmatprep.subr.bf16.mxu0 %v2622_v59 }
  0xf9   :  { %1777 = vmatpush1.bf16.msra.mxu1 %v2617_v60 }
  0xfa   :  { %1949 = vmatpush1.bf16.msra.mxu0 %v2620_v61  ;;  %1778 = vmatprep.subr.bf16.mxu1 %v2625_v62 }
  0xfb   :  { %1950 = vmatprep.subr.bf16.mxu0 %v2628_v63 }
  0xfd   :  { %1779 = vmatpush1.bf16.msra.mxu1 %v2623_v0 }
  0xfe   :  { %1951 = vmatpush1.bf16.msra.mxu0 %v2626_v1  ;;  %1780 = vmatprep.subr.bf16.mxu1 %v2631_v2 }
  0xff   :  { %1952 = vmatprep.subr.bf16.mxu0 %v2634_v3 }
 0x101   :  { %1781 = vmatpush1.bf16.msra.mxu1 %v2629_v4 }
 0x102   :  { %1953 = vmatpush1.bf16.msra.mxu0 %v2632_v5  ;;  %1782 = vmatprep.subr.bf16.mxu1 %v2637_v6 }
 0x103   :  { %1954 = vmatprep.subr.bf16.mxu0 %v2640_v7 }
 0x105   :  { %1783 = vmatpush1.bf16.msra.mxu1 %v2635_v8 }
 0x106   :  { %1955 = vmatpush1.bf16.msra.mxu0 %v2638_v9  ;;  %1784 = vmatprep.subr.bf16.mxu1 %v2643_v10 }
 0x107   :  { %1956 = vmatprep.subr.bf16.mxu0 %v2646_v11 }
 0x109   :  { %1785 = vmatpush1.bf16.msra.mxu1 %v2641_v12 }
 0x10a   :  { %1957 = vmatpush1.bf16.msra.mxu0 %v2644_v13  ;;  %1786 = vmatprep.subr.bf16.mxu1 %v2649_v14 }
 0x10b   :  { %1958 = vmatprep.subr.bf16.mxu0 %v2652_v15 }
 0x10d   :  { %1787 = vmatpush1.bf16.msra.mxu1 %v2647_v16 }
 0x10e   :  { %1959 = vmatpush1.bf16.msra.mxu0 %v2650_v17  ;;  %1788 = vmatprep.subr.bf16.mxu1 %v2655_v18 }
 0x10f   :  { %1960 = vmatprep.subr.bf16.mxu0 %v2658_v19 }
 0x111   :  { %1789 = vmatpush1.bf16.msra.mxu1 %v2653_v20 }
 0x112   :  { %1961 = vmatpush1.bf16.msra.mxu0 %v2656_v21  ;;  %1790 = vmatprep.subr.bf16.mxu1 %v2661_v22 }
 0x113   :  { %1962 = vmatprep.subr.bf16.mxu0 %v2664_v23 }
 0x115   :  { %1791 = vmatpush1.bf16.msra.mxu1 %v2659_v24 }
 0x116   :  { %1963 = vmatpush1.bf16.msra.mxu0 %v2662_v25  ;;  %1792 = vmatprep.subr.bf16.mxu1 %v2667_v26 }
 0x117   :  { %1964 = vmatprep.subr.bf16.mxu0 %v2670_v27 }
 0x119   :  { %1793 = vmatpush1.bf16.msra.mxu1 %v2665_v28 }
 0x11a   :  { %1965 = vmatpush1.bf16.msra.mxu0 %v2668_v29  ;;  %1794 = vmatprep.subr.bf16.mxu1 %v2673_v30 }
 0x11b   :  { %1966 = vmatprep.subr.bf16.mxu0 %v2676_v31 }
 0x11d   :  { %1795 = vmatpush1.bf16.msra.mxu1 %v2671_v32 }
 0x11e   :  { %1967 = vmatpush1.bf16.msra.mxu0 %v2674_v33  ;;  %1796 = vmatprep.subr.bf16.mxu1 %v2679_v34 }
 0x11f   :  { %1968 = vmatprep.subr.bf16.mxu0 %v2682_v35 }
 0x121   :  { %1797 = vmatpush1.bf16.msra.mxu1 %v2677_v36 }
 0x122   :  { %1969 = vmatpush1.bf16.msra.mxu0 %v2680_v37  ;;  %1798 = vmatprep.subr.bf16.mxu1 %v2685_v38 }
 0x123   :  { %1970 = vmatprep.subr.bf16.mxu0 %v2688_v39 }
 0x125   :  { %1799 = vmatpush1.bf16.msra.mxu1 %v2683_v40 }
 0x126   :  { %1971 = vmatpush1.bf16.msra.mxu0 %v2686_v41 }
 0x128   :  { %1801 = vmatmul.mubr.bf16.vlgmr.msra.gmra.mrb[0].mxu1 %v81_v46 }
 0x129   :  { %1973 = vmatmul.mubr.bf16.vlgmr.msra.gmra.mrb[0].mxu0 %v89_v47 }
 0x1fb   :  { %v1802_v55 = vpop.f32.mrb[0].mxu1 }
 0x1fc   :  { %v1974_v56 = vpop.f32.mrb[0].mxu0  ;;  %v2265_v57 = vadd.f32 %v1802_v55, %v352_v53  ;;  %v1804_v58 = vpop.f32.mrb[1].mxu1 }
 0x1fd   :  { %v1976_v59 = vpop.f32.mrb[1].mxu0  ;;  %v2267_v60 = vadd.f32 %v1804_v58, %v356_v54  ;;  %v1806_v61 = vpop.f32.mrb[2].mxu1 }
 0x1fe   :  { %v1978_v62 = vpop.f32.mrb[2].mxu0  ;;  %v2266_v63 = vadd.f32 %v2265_v57, %v1974_v56  ;;  %v2269_v0 = vadd.f32 %v1806_v61, %v352_v53  ;;  %v1808_v1 = vpop.f32.mrb[3].mxu1 }
 0x1ff   :  { %v1980_v2 = vpop.f32.mrb[3].mxu0  ;;  %v2268_v3 = vadd.f32 %v2267_v60, %v1976_v59  ;;  %v2271_v4 = vadd.f32 %v1808_v1, %v356_v54 }
 0x200   :  { %v1983_v5 = vmax.f32 %v2266_v63, 0.0  ;;  %v2270_v6 = vadd.f32 %v2269_v0, %v1978_v62 }
 0x201   :  { %v1984_v7 = vmax.f32 %v2268_v3, 0.0  ;;  %v2272_v8 = vadd.f32 %v2271_v4, %v1980_v2 }
 0x202   :  { %1987 = vst [vmem:[#allocation7] sm:$0xff] %v1983_v5  ;;  %v1985_v9 = vmax.f32 %v2270_v6, 0.0 }
 0x203   :  { %1988 = vst [vmem:[#allocation7 + $0x8] sm:$0xff] %v1984_v7  ;;  %v1986_v10 = vmax.f32 %v2272_v8, 0.0 }
 0x204   :  { %1989 = vst [vmem:[#allocation7 + $0x10] sm:$0xff] %v1985_v9 }
 0x205   :  { %1990 = vst [vmem:[#allocation7 + $0x18] sm:$0xff] %v1986_v10 }
 0x206   :  { %2744 = shalt.err (!%p2741_p6)
}
 0x207   :  { %s2745_s16 = scalar_lea.hbm %s2831_s3, 512 }
 0x208   :  { %p2746_p7 = scmp.ne.s32.totalorder %s2831_s3, %s2745_s16  ;;  %p2749_p8 = scmp.lt.u32.totalorder %s2745_s16, %s2831_s3 }
 0x20a   :  { %p2751_p9 = pnand %p2749_p8, %p2746_p7 }
 0x20c   :  { %2754 = shalt.err (!%p2751_p9)
}
 0x20d   :  { %s2767_s21 = smov 256   ;;  %s2768_s22 = smov 16  }
 0x20e   :  { %2002 = dma.vmem_to_hbm [thread:$0]  %s1997_s13, 512, %s2831_s3, [#allocation4], %s2767_s21, %s2767_s21, %s2768_s22  }
 0x20f   :  { %2759 = dma.done.wait [#allocation4], 512  }
 0x210   :  { %2760 = vsyncadd [#allocation4], 4294966784 }
 0x211   :  { %2006 = vsyncpa [#allocation3], 1 }
 0x212   :  { %2007 = vsyncpa [#allocation6], 1 }
 0x213   :  { %2008 = vsyncpa [#allocation4], 1 }

</bundles_post_ra>
